<compile_context>
chip_gen: v7x
topology: tpu7x:2x2x1
jax: 0.10.0
libtpu: 0.0.40
codegen_flags: <defaults>
</compile_context>

<pallas_src>
import jax
import jax.numpy as jnp
from jax.experimental import pallas as pl
from jax.experimental.pallas import tpu as pltpu  # noqa: F401  (TPU backend)

N_EXPAND = 40    # the hard-coded .expand(B, 40) in the PyTorch forward
N_HEADS = 3      # a, b, c
HEAD_PAD = 128   # lane-dense padding for the fused head output


def _full_spec(shape):
    # whole-array block, single grid point
    return pl.BlockSpec(shape, lambda: (0,) * len(shape))


def _context_to_params_kernel(x_ref, w_in_ref, w_hid_ref, b_ref,
                              w_head_ref, b_head_ref, out_ref):
    # Trunk layer 0: (B, latent) @ (latent, H)   [bf16 x bf16 -> f32 acc]
    h = jnp.dot(x_ref[...].astype(jnp.bfloat16), w_in_ref[...],
                preferred_element_type=jnp.float32)
    h = jnp.maximum(h + b_ref[0:1, :], 0.0)          # bias + ReLU in f32

    # Trunk layers 1..4, unrolled with static indices into the stacked weights.
    for i in range(4):
        h = jnp.dot(h.astype(jnp.bfloat16), w_hid_ref[i],
                    preferred_element_type=jnp.float32)
        h = jnp.maximum(h + b_ref[i + 1:i + 2, :], 0.0)

    # Fused, lane-padded heads: (B, H) @ (H, 128); cols [0:3] = [a, b, c].
    heads = jnp.dot(h.astype(jnp.bfloat16), w_head_ref[...],
                    preferred_element_type=jnp.float32)
    out_ref[...] = heads + b_head_ref[...]           # lane-dense (B, 128) store


def context_to_params_forward(t, f, context, params):
    """JAX wrapper mirroring ContextToParams.forward(t, f, context)."""
    del t, f  # unused by the PyTorch forward as well
    w_in, w_hid, biases, w_head, b_head = params
    B = context.shape[0]

    in_arrays = (context, w_in, w_hid, biases, w_head, b_head)
    heads_padded = pl.pallas_call(
        _context_to_params_kernel,
        out_shape=jax.ShapeDtypeStruct((B, HEAD_PAD), jnp.float32),
        in_specs=[_full_spec(a.shape) for a in in_arrays],
        out_specs=_full_spec((B, HEAD_PAD)),
    )(*in_arrays)

    heads = heads_padded[:, :N_HEADS]                # (B, 3)
    # expand(B, 40) on each head + stack(dim=2) is a pure broadcast; do it as
    # a free XLA broadcast instead of masked 3-wide stores inside the kernel.
    return jnp.broadcast_to(heads[:, None, :], (B, N_EXPAND, N_HEADS))


def init_params(key, latent_dim, hidden_dim):
    """Deterministic synthetic weights, pre-packed for the kernel."""
    def uni(k, shape, fan_in):
        s = 1.0 / jnp.sqrt(jnp.float32(fan_in))
        return jax.random.uniform(k, shape, jnp.float32, -s, s)

    ks = jax.random.split(key, 12)
    # Trunk weights: layer0 (latent, H); layers1..4 stacked (4, H, H). bf16.
    w_in = uni(ks[0], (latent_dim, hidden_dim), latent_dim).astype(jnp.bfloat16)
    w_hid = jnp.stack([uni(ks[1 + i], (hidden_dim, hidden_dim), hidden_dim)
                       for i in range(4)]).astype(jnp.bfloat16)
    # Trunk biases stacked (5, H), kept in f32 (elementwise path).
    b0 = uni(ks[5], (hidden_dim,), latent_dim)
    b_rest = [uni(ks[6 + i], (hidden_dim,), hidden_dim) for i in range(4)]
    biases = jnp.stack([b0] + b_rest)                       # (5, H) f32
    # Fused a/b/c heads, lane-padded to 128 columns (cols 3.. are zero).
    wh = uni(ks[10], (hidden_dim, N_HEADS), hidden_dim)     # columns [a, b, c]
    bh = uni(ks[11], (1, N_HEADS), hidden_dim)
    w_head = jnp.zeros((hidden_dim, HEAD_PAD), jnp.float32)
    w_head = w_head.at[:, :N_HEADS].set(wh).astype(jnp.bfloat16)
    b_head = jnp.zeros((1, HEAD_PAD), jnp.float32).at[:, :N_HEADS].set(bh)
    return (w_in, w_hid, biases, w_head, b_head)


def reference_forward(context, params):
    """Pure-JAX reference with identical bf16-weight numerics."""
    w_in, w_hid, biases, w_head, b_head = params
    h = jnp.dot(context.astype(jnp.bfloat16), w_in,
                preferred_element_type=jnp.float32)
    h = jnp.maximum(h + biases[0:1, :], 0.0)
    for i in range(4):
        h = jnp.dot(h.astype(jnp.bfloat16), w_hid[i],
                    preferred_element_type=jnp.float32)
        h = jnp.maximum(h + biases[i + 1:i + 2, :], 0.0)
    heads = jnp.dot(h.astype(jnp.bfloat16), w_head,
                    preferred_element_type=jnp.float32) + b_head
    heads = heads[:, :N_HEADS]
    return jnp.broadcast_to(heads[:, None, :],
                            (context.shape[0], N_EXPAND, N_HEADS))


if __name__ == "__main__":
    # Small shapes consistent with the module.
    B, LATENT_DIM, HIDDEN_DIM = 8, 32, 256

    key = jax.random.PRNGKey(0)
    k_ctx, k_t, k_f, k_params = jax.random.split(key, 4)

    context = jax.random.normal(k_ctx, (B, LATENT_DIM), jnp.float32)
    t = jax.random.normal(k_t, (B, 1), jnp.float32)  # unused (signature parity)
    f = jax.random.normal(k_f, (B, 1), jnp.float32)  # unused (signature parity)

    params = init_params(k_params, LATENT_DIM, HIDDEN_DIM)

    out = context_to_params_forward(t, f, context, params)
    out = jax.block_until_ready(out)

    ref = reference_forward(context, params)
    assert out.shape == (B, N_EXPAND, N_HEADS), out.shape
    assert jnp.allclose(out, ref, atol=2e-3, rtol=2e-3), "mismatch vs reference"

    print("KERNEL_OK")
</pallas_src>

<mosaic_0001>
module attributes {stable_mosaic.version = 11 : i64} {
  func.func @_context_to_params_kernel(%arg0: memref<8x32xf32, #tpu.memory_space<vmem>>, %arg1: memref<32x256xbf16, #tpu.memory_space<vmem>>, %arg2: memref<4x256x256xbf16, #tpu.memory_space<vmem>>, %arg3: memref<5x256xf32, #tpu.memory_space<vmem>>, %arg4: memref<256x128xbf16, #tpu.memory_space<vmem>>, %arg5: memref<1x128xf32, #tpu.memory_space<vmem>>, %arg6: memref<8x128xf32, #tpu.memory_space<vmem>>) attributes {dimension_semantics = [], scalar_prefetch = 0 : i64, scratch_operands = 0 : i64, tpu.core_type = #tpu.core_type<tc>} {
    %c0 = arith.constant 0 : index
    %c0_0 = arith.constant 0 : index
    %0 = vector.load %arg0[%c0, %c0_0] : memref<8x32xf32, #tpu.memory_space<vmem>>, vector<8x32xf32>
    %1 = arith.truncf %0 : vector<8x32xf32> to vector<8x32xbf16>
    %c0_1 = arith.constant 0 : index
    %c0_2 = arith.constant 0 : index
    %2 = vector.load %arg1[%c0_1, %c0_2] : memref<32x256xbf16, #tpu.memory_space<vmem>>, vector<32x256xbf16>
    %cst = arith.constant dense<0.000000e+00> : vector<8x256xf32>
    %3 = tpu.matmul %1, %2, %cst {dimension_numbers = #tpu.dot_dimension_numbers<[1], [0], [0], [1], [0, 0, 1, 1], [], []>} : vector<8x32xbf16>, vector<32x256xbf16>, vector<8x256xf32> -> vector<8x256xf32>
    %c0_3 = arith.constant 0 : index
    %c0_4 = arith.constant 0 : index
    %4 = vector.load %arg3[%c0_3, %c0_4] : memref<5x256xf32, #tpu.memory_space<vmem>>, vector<1x256xf32>
    %5 = vector.broadcast %4 : vector<1x256xf32> to vector<8x256xf32>
    %6 = arith.addf %3, %5 : vector<8x256xf32>
    %cst_5 = arith.constant 0.000000e+00 : f32
    %7 = vector.broadcast %cst_5 : f32 to vector<8x256xf32>
    %8 = arith.maximumf %6, %7 : vector<8x256xf32>
    %9 = arith.truncf %8 : vector<8x256xf32> to vector<8x256xbf16>
    %c0_6 = arith.constant 0 : index
    %c0_7 = arith.constant 0 : index
    %c0_8 = arith.constant 0 : index
    %10 = vector.load %arg2[%c0_6, %c0_7, %c0_8] : memref<4x256x256xbf16, #tpu.memory_space<vmem>>, vector<1x256x256xbf16>
    %11 = vector.shape_cast %10 : vector<1x256x256xbf16> to vector<256x256xbf16>
    %cst_9 = arith.constant dense<0.000000e+00> : vector<8x256xf32>
    %12 = tpu.matmul %9, %11, %cst_9 {dimension_numbers = #tpu.dot_dimension_numbers<[1], [0], [0], [1], [0, 0, 1, 1], [], []>} : vector<8x256xbf16>, vector<256x256xbf16>, vector<8x256xf32> -> vector<8x256xf32>
    %c1 = arith.constant 1 : index
    %c0_10 = arith.constant 0 : index
    %13 = vector.load %arg3[%c1, %c0_10] : memref<5x256xf32, #tpu.memory_space<vmem>>, vector<1x256xf32>
    %14 = vector.broadcast %13 : vector<1x256xf32> to vector<8x256xf32>
    %15 = arith.addf %12, %14 : vector<8x256xf32>
    %cst_11 = arith.constant 0.000000e+00 : f32
    %16 = vector.broadcast %cst_11 : f32 to vector<8x256xf32>
    %17 = arith.maximumf %15, %16 : vector<8x256xf32>
    %18 = arith.truncf %17 : vector<8x256xf32> to vector<8x256xbf16>
    %c1_12 = arith.constant 1 : index
    %c0_13 = arith.constant 0 : index
    %c0_14 = arith.constant 0 : index
    %19 = vector.load %arg2[%c1_12, %c0_13, %c0_14] : memref<4x256x256xbf16, #tpu.memory_space<vmem>>, vector<1x256x256xbf16>
    %20 = vector.shape_cast %19 : vector<1x256x256xbf16> to vector<256x256xbf16>
    %cst_15 = arith.constant dense<0.000000e+00> : vector<8x256xf32>
    %21 = tpu.matmul %18, %20, %cst_15 {dimension_numbers = #tpu.dot_dimension_numbers<[1], [0], [0], [1], [0, 0, 1, 1], [], []>} : vector<8x256xbf16>, vector<256x256xbf16>, vector<8x256xf32> -> vector<8x256xf32>
    %c2 = arith.constant 2 : index
    %c0_16 = arith.constant 0 : index
    %22 = vector.load %arg3[%c2, %c0_16] : memref<5x256xf32, #tpu.memory_space<vmem>>, vector<1x256xf32>
    %23 = vector.broadcast %22 : vector<1x256xf32> to vector<8x256xf32>
    %24 = arith.addf %21, %23 : vector<8x256xf32>
    %cst_17 = arith.constant 0.000000e+00 : f32
    %25 = vector.broadcast %cst_17 : f32 to vector<8x256xf32>
    %26 = arith.maximumf %24, %25 : vector<8x256xf32>
    %27 = arith.truncf %26 : vector<8x256xf32> to vector<8x256xbf16>
    %c2_18 = arith.constant 2 : index
    %c0_19 = arith.constant 0 : index
    %c0_20 = arith.constant 0 : index
    %28 = vector.load %arg2[%c2_18, %c0_19, %c0_20] : memref<4x256x256xbf16, #tpu.memory_space<vmem>>, vector<1x256x256xbf16>
    %29 = vector.shape_cast %28 : vector<1x256x256xbf16> to vector<256x256xbf16>
    %cst_21 = arith.constant dense<0.000000e+00> : vector<8x256xf32>
    %30 = tpu.matmul %27, %29, %cst_21 {dimension_numbers = #tpu.dot_dimension_numbers<[1], [0], [0], [1], [0, 0, 1, 1], [], []>} : vector<8x256xbf16>, vector<256x256xbf16>, vector<8x256xf32> -> vector<8x256xf32>
    %c3 = arith.constant 3 : index
    %c0_22 = arith.constant 0 : index
    %31 = vector.load %arg3[%c3, %c0_22] : memref<5x256xf32, #tpu.memory_space<vmem>>, vector<1x256xf32>
    %32 = vector.broadcast %31 : vector<1x256xf32> to vector<8x256xf32>
    %33 = arith.addf %30, %32 : vector<8x256xf32>
    %cst_23 = arith.constant 0.000000e+00 : f32
    %34 = vector.broadcast %cst_23 : f32 to vector<8x256xf32>
    %35 = arith.maximumf %33, %34 : vector<8x256xf32>
    %36 = arith.truncf %35 : vector<8x256xf32> to vector<8x256xbf16>
    %c3_24 = arith.constant 3 : index
    %c0_25 = arith.constant 0 : index
    %c0_26 = arith.constant 0 : index
    %37 = vector.load %arg2[%c3_24, %c0_25, %c0_26] : memref<4x256x256xbf16, #tpu.memory_space<vmem>>, vector<1x256x256xbf16>
    %38 = vector.shape_cast %37 : vector<1x256x256xbf16> to vector<256x256xbf16>
    %cst_27 = arith.constant dense<0.000000e+00> : vector<8x256xf32>
    %39 = tpu.matmul %36, %38, %cst_27 {dimension_numbers = #tpu.dot_dimension_numbers<[1], [0], [0], [1], [0, 0, 1, 1], [], []>} : vector<8x256xbf16>, vector<256x256xbf16>, vector<8x256xf32> -> vector<8x256xf32>
    %c4 = arith.constant 4 : index
    %c0_28 = arith.constant 0 : index
    %40 = vector.load %arg3[%c4, %c0_28] : memref<5x256xf32, #tpu.memory_space<vmem>>, vector<1x256xf32>
    %41 = vector.broadcast %40 : vector<1x256xf32> to vector<8x256xf32>
    %42 = arith.addf %39, %41 : vector<8x256xf32>
    %cst_29 = arith.constant 0.000000e+00 : f32
    %43 = vector.broadcast %cst_29 : f32 to vector<8x256xf32>
    %44 = arith.maximumf %42, %43 : vector<8x256xf32>
    %45 = arith.truncf %44 : vector<8x256xf32> to vector<8x256xbf16>
    %c0_30 = arith.constant 0 : index
    %c0_31 = arith.constant 0 : index
    %46 = vector.load %arg4[%c0_30, %c0_31] : memref<256x128xbf16, #tpu.memory_space<vmem>>, vector<256x128xbf16>
    %cst_32 = arith.constant dense<0.000000e+00> : vector<8x128xf32>
    %47 = tpu.matmul %45, %46, %cst_32 {dimension_numbers = #tpu.dot_dimension_numbers<[1], [0], [0], [1], [0, 0, 1, 1], [], []>} : vector<8x256xbf16>, vector<256x128xbf16>, vector<8x128xf32> -> vector<8x128xf32>
    %c0_33 = arith.constant 0 : index
    %c0_34 = arith.constant 0 : index
    %48 = vector.load %arg5[%c0_33, %c0_34] : memref<1x128xf32, #tpu.memory_space<vmem>>, vector<1x128xf32>
    %49 = vector.broadcast %48 : vector<1x128xf32> to vector<8x128xf32>
    %50 = arith.addf %47, %49 : vector<8x128xf32>
    %c0_35 = arith.constant 0 : index
    %c0_36 = arith.constant 0 : index
    %51 = vector.load %arg6[%c0_35, %c0_36] : memref<8x128xf32, #tpu.memory_space<vmem>>, vector<8x128xf32>
    tpu.vector_store %arg6[%c0_35, %c0_36], %50 {strides = array<i32>} : memref<8x128xf32, #tpu.memory_space<vmem>>, vector<8x128xf32>,
    return
  }
}

</mosaic_0001>

<bundles_post_ra>
// kernel: tpu_custom_call.1
= control target key start
LH: loop header
LB: loop body
LE: loop exit
PB: predicated region body
PF: predicated region fallthrough
CT: control target
= control target key end

     0   :  { %11 = vsyncpa [#allocation3], 0  ;;  %s2050_s0 = inlined_call_operand.hbm [shape: f32[8,32], index: 0, kind: input, shape index: {}]   ;;  %s2051_s1 = inlined_call_operand.hbm [shape: bf16[32,256], index: 1, kind: input, shape index: {}]   ;;  %s2052_s2 = inlined_call_operand.hbm [shape: bf16[4,256,256], index: 2, kind: input, shape index: {}]   ;;  %s2053_s3 = inlined_call_operand.hbm [shape: f32[5,256], index: 3, kind: input, shape index: {}]   ;;  %s2054_s4 = inlined_call_operand.hbm [shape: bf16[256,128], index: 4, kind: input, shape index: {}]   ;;  %s2055_s5 = inlined_call_operand.vmem [shape: f32[1,128], index: 5, kind: input, shape index: {}]   ;;  %s2056_s6 = inlined_call_operand.hbm [shape: f32[8,128], index: 6, kind: output, shape index: {}]  }
   0x1   :  { %12 = vsyncpa [#allocation6], 0 }
   0x2   :  { %13 = vsyncpa [#allocation9], 0 }
   0x3   :  { %14 = vsyncpa [#allocation4], 0  ;;  %s1909_s21 = smov [#allocation5]   ;;  %s1769_s25 = scalar_lea.hbm %s2051_s1, 512 }
   0x4   :  { %s30_s22 = sshll.u32 %s1909_s21, 4  ;;  %p1770_p0 = scmp.ne.s32.totalorder %s2051_s1, %s1769_s25  ;;  %s31_s22 = int_to_ptr.vmem [resolvable:$true] %s30_s22 }
   0x5   :  { %p1773_p1 = scmp.lt.u32.totalorder %s1769_s25, %s2051_s1 }
   0x7   :  { %p1775_p2 = pnand %p1773_p1, %p1770_p0 }
   0x9   :  { %1778 = shalt.err (!%p1775_p2)
}
   0xa   :  { %s1779_s30 = scalar_lea.vmem %s31_s22, 512  ;;  %p1784_p4 = scmp.lt.s32.totalorder %s31_s22, %s31_s22 }
   0xb   :  { %p1780_p3 = scmp.ne.s32.totalorder %s31_s22, %s1779_s30  ;;  %p1785_p5 = scmp.lt.s32.totalorder %s1779_s30, %s1779_s30 }
   0xd   :  { %p1786_p6 = por %p1785_p5, %p1784_p4 }
   0xf   :  { %p1787_p7 = pnand %p1786_p6, %p1780_p3 }
  0x11   :  { %1790 = shalt.err (!%p1787_p7)
}
  0x12   :  { %s1910_s7 = smov 128   ;;  %s1911_s8 = smov 8  }
  0x13   :  { %36 = dma.hbm_to_vmem [thread:$0]  %s2051_s1, 512, %s31_s22, [#allocation6], %s1910_s7, %s1910_s7, %s1911_s8  }
  0x14   :  { %s1912_s11 = smov [#allocation8]   ;;  %s1913_s13 = smov [#allocation2]  }
  0x15   :  { %s55_s12 = sshll.u32 %s1912_s11, 4  ;;  %s21_s14 = sshll.u32 %s1913_s13, 4  ;;  %s56_s12 = int_to_ptr.vmem [resolvable:$true] %s55_s12  ;;  %s22_s14 = int_to_ptr.vmem [resolvable:$true] %s21_s14 }
  0x16   :  { %s1791_s17 = scalar_lea.hbm %s2053_s3, 256 }
  0x17   :  { %p1792_p8 = scmp.ne.s32.totalorder %s2053_s3, %s1791_s17  ;;  %p1795_p9 = scmp.lt.u32.totalorder %s1791_s17, %s2053_s3 }
  0x19   :  { %p1797_p10 = pnand %p1795_p9, %p1792_p8 }
  0x1b   :  { %1800 = shalt.err (!%p1797_p10)
}
  0x1c   :  { %s1801_s1 = scalar_lea.vmem %s56_s12, 256  ;;  %p1806_p12 = scmp.lt.s32.totalorder %s56_s12, %s56_s12 }
  0x1d   :  { %p1802_p11 = scmp.ne.s32.totalorder %s56_s12, %s1801_s1  ;;  %p1807_p13 = scmp.lt.s32.totalorder %s1801_s1, %s1801_s1 }
  0x1f   :  { %p1808_p0 = por %p1807_p13, %p1806_p12 }
  0x21   :  { %p1809_p1 = pnand %p1808_p0, %p1802_p11 }
  0x23   :  { %1812 = shalt.err (!%p1809_p1)
}
  0x24   :  { %58 = dma.hbm_to_vmem [thread:$0]  %s2053_s3, 256, %s56_s12, [#allocation9]  }
  0x25   :  { %s1813_s26 = scalar_lea.hbm %s2050_s0, 128 }
  0x26   :  { %p1814_p2 = scmp.ne.s32.totalorder %s2050_s0, %s1813_s26  ;;  %p1817_p3 = scmp.lt.u32.totalorder %s1813_s26, %s2050_s0 }
  0x28   :  { %p1819_p4 = pnand %p1817_p3, %p1814_p2 }
  0x2a   :  { %1822 = shalt.err (!%p1819_p4)
}
  0x2b   :  { %s1823_s9 = scalar_lea.vmem %s22_s14, 128  ;;  %p1828_p6 = scmp.lt.s32.totalorder %s22_s14, %s22_s14 }
  0x2c   :  { %p1824_p5 = scmp.ne.s32.totalorder %s22_s14, %s1823_s9  ;;  %p1829_p7 = scmp.lt.s32.totalorder %s1823_s9, %s1823_s9 }
  0x2e   :  { %p1830_p8 = por %p1829_p7, %p1828_p6 }
  0x30   :  { %p1831_p9 = pnand %p1830_p8, %p1824_p5 }
  0x32   :  { %1834 = shalt.err (!%p1831_p9)
}
  0x33   :  { %24 = dma.hbm_to_vmem [thread:$0]  %s2050_s0, 128, %s22_s14, [#allocation3]  }
  0x34   :  { %s1914_s11 = smov [#allocation7]   ;;  %s1915_s13 = smov [#allocation10]  }
  0x35   :  { %s42_s12 = sshll.u32 %s1914_s11, 4  ;;  %s64_s15 = sshll.u32 %s1915_s13, 4  ;;  %s43_s12 = int_to_ptr.vmem [resolvable:$true] %s42_s12  ;;  %s65_s15 = int_to_ptr.vmem [resolvable:$true] %s64_s15 }
  0x36   :  { %s1835_s18 = scalar_lea.hbm %s2052_s2, 16384 }
  0x37   :  { %p1836_p10 = scmp.ne.s32.totalorder %s2052_s2, %s1835_s18  ;;  %p1839_p11 = scmp.lt.u32.totalorder %s1835_s18, %s2052_s2 }
  0x39   :  { %p1841_p12 = pnand %p1839_p11, %p1836_p10 }
  0x3b   :  { %1844 = shalt.err (!%p1841_p12)
}
  0x3c   :  { %s1845_s0 = scalar_lea.vmem %s43_s12, 16384  ;;  %p1850_p0 = scmp.lt.s32.totalorder %s43_s12, %s43_s12 }
  0x3d   :  { %p1846_p13 = scmp.ne.s32.totalorder %s43_s12, %s1845_s0  ;;  %p1851_p1 = scmp.lt.s32.totalorder %s1845_s0, %s1845_s0 }
  0x3f   :  { %p1852_p2 = por %p1851_p1, %p1850_p0 }
  0x41   :  { %p1853_p3 = pnand %p1852_p2, %p1846_p13 }
  0x43   :  { %1856 = shalt.err (!%p1853_p3)
}
  0x44   :  { %48 = dma.hbm_to_vmem [thread:$0]  %s2052_s2, 16384, %s43_s12, [#allocation6], %s1910_s7, %s1910_s7, %s1911_s8  }
  0x45   :  { %s1857_s25 = scalar_lea.hbm %s2054_s4, 2048 }
  0x46   :  { %p1858_p4 = scmp.ne.s32.totalorder %s2054_s4, %s1857_s25  ;;  %p1861_p5 = scmp.lt.u32.totalorder %s1857_s25, %s2054_s4 }
  0x48   :  { %p1863_p6 = pnand %p1861_p5, %p1858_p4 }
  0x4a   :  { %1866 = shalt.err (!%p1863_p6)
}
  0x4b   :  { %s1867_s30 = scalar_lea.vmem %s65_s15, 2048  ;;  %p1872_p8 = scmp.lt.s32.totalorder %s65_s15, %s65_s15 }
  0x4c   :  { %p1868_p7 = scmp.ne.s32.totalorder %s65_s15, %s1867_s30  ;;  %p1873_p9 = scmp.lt.s32.totalorder %s1867_s30, %s1867_s30 }
  0x4e   :  { %p1874_p10 = por %p1873_p9, %p1872_p8 }
  0x50   :  { %p1875_p11 = pnand %p1874_p10, %p1868_p7 }
  0x52   :  { %1878 = shalt.err (!%p1875_p11)
}
  0x53   :  { %s1916_s2 = smov 64   ;;  %s1917_s7 = smov 4  }
  0x54   :  { %70 = dma.hbm_to_vmem [thread:$0]  %s2054_s4, 2048, %s65_s15, [#allocation9], %s1916_s2, %s1916_s2, %s1917_s7  }
  0x55   :  { %1901 = dma.done.wait [#allocation3], 128  }
  0x56   :  { %1902 = vsyncadd [#allocation3], 4294967168 }
  0x57   :  { %1903 = dma.done.wait [#allocation6], 16896  }
  0x58   :  { %1904 = vsyncadd [#allocation6], 4294950400 }
  0x59   :  { %1905 = dma.done.wait [#allocation9], 2304  }
  0x5a   :  { %1906 = vsyncadd [#allocation9], 4294964992  ;;  %v1918_v0 = vmov 0   ;;  %v1555_v1 = vld [vmem:[#allocation5 + $0x4] ss:$8 sps:$4 sm:$0xff]   ;;  %v89_v5 = vld [vmem:[#allocation2] sm:$0xff] }
  0x5b   :  { %163 = vmatprep.mubr.bf16.mxu0 %v1918_v0  ;;  %v1557_v2 = vld [vmem:[#allocation5] ss:$8 sps:$4 sm:$0xff]   ;;  %131 = vmatprep.subr.bf16.mxu0 %v1555_v1  ;;  %v1558_v3 = vld [vmem:[#allocation5 + $0x14] ss:$8 sps:$4 sm:$0xff]   ;;  %v1560_v4 = vld [vmem:[#allocation5 + $0x10] ss:$8 sps:$4 sm:$0xff]   ;;  %v90_v9 = vpack.c.bf16 %v89_v5, %v89_v5 }
  0x5c   :  { %132 = vmatpush1.bf16.msra.mxu0 %v1557_v2  ;;  %v1561_v6 = vld [vmem:[#allocation7 + $0x4] ss:$8 sps:$4 sm:$0xff]   ;;  %v1563_v7 = vld [vmem:[#allocation7] ss:$8 sps:$4 sm:$0xff]   ;;  %v1564_v8 = vld [vmem:[#allocation7 + $0x14] ss:$8 sps:$4 sm:$0xff]  }
  0x5d   :  { %133 = vmatprep.subr.bf16.mxu0 %v1558_v3  ;;  %381 = vmatprep.subr.bf16.mxu1 %v1561_v6  ;;  %v1566_v10 = vld [vmem:[#allocation7 + $0x10] ss:$8 sps:$4 sm:$0xff]   ;;  %vm127_vm0 = vcmask 261120   ;;  %v1567_v11 = vld [vmem:[#allocation7 + $0x24] ss:$8 sps:$4 sm:$0xff]   ;;  %v97_v3 = vlaneseq  ;;  %s1919_s10 = smov [#allocation11]  }
  0x5e   :  { %382 = vmatpush1.bf16.msra.mxu1 %v1563_v7  ;;  %v1569_v12 = vld [vmem:[#allocation7 + $0x20] ss:$8 sps:$4 sm:$0xff]   ;;  %v1570_v13 = vld [vmem:[#allocation7 + $0x34] ss:$8 sps:$4 sm:$0xff]   ;;  %v1572_v14 = vld [vmem:[#allocation7 + $0x30] ss:$8 sps:$4 sm:$0xff]  }
  0x5f   :  { %383 = vmatprep.subr.bf16.mxu1 %v1564_v8  ;;  %v1573_v15 = vld [vmem:[#allocation7 + $0x44] ss:$8 sps:$4 sm:$0xff]   ;;  %v1575_v16 = vld [vmem:[#allocation7 + $0x40] ss:$8 sps:$4 sm:$0xff]   ;;  %v1576_v17 = vld [vmem:[#allocation7 + $0x54] ss:$8 sps:$4 sm:$0xff]  }
  0x60   :  { %134 = vmatpush1.bf16.msra.mxu0 %v1560_v4  ;;  %v1578_v18 = vld [vmem:[#allocation7 + $0x50] ss:$8 sps:$4 sm:$0xff]   ;;  %v1579_v19 = vld [vmem:[#allocation7 + $0x64] ss:$8 sps:$4 sm:$0xff]   ;;  %v1581_v20 = vld [vmem:[#allocation7 + $0x60] ss:$8 sps:$4 sm:$0xff]  }
  0x61   :  { %v1582_v21 = vld [vmem:[#allocation7 + $0x74] ss:$8 sps:$4 sm:$0xff]   ;;  %v1584_v22 = vld [vmem:[#allocation7 + $0x70] ss:$8 sps:$4 sm:$0xff]   ;;  %v1585_v23 = vld [vmem:[#allocation7 + $0x84] ss:$8 sps:$4 sm:$0xff]  }
  0x62   :  { %384 = vmatpush1.bf16.msra.mxu1 %v1566_v10  ;;  %v1587_v24 = vld [vmem:[#allocation7 + $0x80] ss:$8 sps:$4 sm:$0xff]   ;;  %v1588_v25 = vld [vmem:[#allocation7 + $0x94] ss:$8 sps:$4 sm:$0xff]   ;;  %v1590_v26 = vld [vmem:[#allocation7 + $0x90] ss:$8 sps:$4 sm:$0xff]  }
  0x63   :  { %1376 = vmatmul.mubr.msk.bf16.vlgmr.msra.gmra.mrb[0].mxu0 %vm127_vm0, %v90_v9  ;;  %385 = vmatprep.subr.bf16.mxu1 %v1567_v11  ;;  %v1591_v27 = vld [vmem:[#allocation7 + $0xa4] ss:$8 sps:$4 sm:$0xff]   ;;  %v1593_v28 = vld [vmem:[#allocation7 + $0xa0] ss:$8 sps:$4 sm:$0xff]   ;;  %v1594_v29 = vld [vmem:[#allocation7 + $0xb4] ss:$8 sps:$4 sm:$0xff]  }
  0x64   :  { %v1596_v30 = vld [vmem:[#allocation7 + $0xb0] ss:$8 sps:$4 sm:$0xff]   ;;  %v1597_v31 = vld [vmem:[#allocation7 + $0xc4] ss:$8 sps:$4 sm:$0xff]   ;;  %v1599_v32 = vld [vmem:[#allocation7 + $0xc0] ss:$8 sps:$4 sm:$0xff]  }
  0x65   :  { %v1600_v33 = vld [vmem:[#allocation7 + $0xd4] ss:$8 sps:$4 sm:$0xff]   ;;  %v1602_v34 = vld [vmem:[#allocation7 + $0xd0] ss:$8 sps:$4 sm:$0xff]   ;;  %v1603_v35 = vld [vmem:[#allocation7 + $0xe4] ss:$8 sps:$4 sm:$0xff]  }
  0x66   :  { %386 = vmatpush1.bf16.msra.mxu1 %v1569_v12  ;;  %v1605_v36 = vld [vmem:[#allocation7 + $0xe0] ss:$8 sps:$4 sm:$0xff]   ;;  %v1606_v37 = vld [vmem:[#allocation7 + $0xf4] ss:$8 sps:$4 sm:$0xff]   ;;  %v1608_v38 = vld [vmem:[#allocation7 + $0xf0] ss:$8 sps:$4 sm:$0xff]  }
  0x67   :  { %387 = vmatprep.subr.bf16.mxu1 %v1570_v13  ;;  %v1609_v39 = vld [vmem:[#allocation7 + $0x100] ss:$8 sps:$4 sm:$0xff]   ;;  %v1611_v40 = vld [vmem:[#allocation7 + $0x104] ss:$8 sps:$4 sm:$0xff]   ;;  %v1614_v41 = vld [vmem:[#allocation7 + $0x114] ss:$8 sps:$4 sm:$0xff]  }
  0x68   :  { %632 = vmatprep.subr.bf16.mxu0 %v1611_v40  ;;  %v1612_v42 = vld [vmem:[#allocation7 + $0x110] ss:$8 sps:$4 sm:$0xff]   ;;  %v1617_v43 = vld [vmem:[#allocation7 + $0x124] ss:$8 sps:$4 sm:$0xff]   ;;  %v1615_v44 = vld [vmem:[#allocation7 + $0x120] ss:$8 sps:$4 sm:$0xff]  }
  0x69   :  { %633 = vmatpush1.bf16.msra.mxu0 %v1609_v39  ;;  %v1620_v45 = vld [vmem:[#allocation7 + $0x134] ss:$8 sps:$4 sm:$0xff]   ;;  %v1618_v46 = vld [vmem:[#allocation7 + $0x130] ss:$8 sps:$4 sm:$0xff]   ;;  %v1623_v47 = vld [vmem:[#allocation7 + $0x144] ss:$8 sps:$4 sm:$0xff]  }
  0x6a   :  { %388 = vmatpush1.bf16.msra.mxu1 %v1572_v14  ;;  %634 = vmatprep.subr.bf16.mxu0 %v1614_v41  ;;  %v1621_v48 = vld [vmem:[#allocation7 + $0x140] ss:$8 sps:$4 sm:$0xff]   ;;  %v1626_v49 = vld [vmem:[#allocation7 + $0x154] ss:$8 sps:$4 sm:$0xff]   ;;  %v1624_v50 = vld [vmem:[#allocation7 + $0x150] ss:$8 sps:$4 sm:$0xff]  }
  0x6b   :  { %389 = vmatprep.subr.bf16.mxu1 %v1573_v15  ;;  %v1629_v51 = vld [vmem:[#allocation7 + $0x164] ss:$8 sps:$4 sm:$0xff]   ;;  %v1627_v52 = vld [vmem:[#allocation7 + $0x160] ss:$8 sps:$4 sm:$0xff]   ;;  %v1632_v53 = vld [vmem:[#allocation7 + $0x174] ss:$8 sps:$4 sm:$0xff]  }
  0x6c   :  { %v1630_v54 = vld [vmem:[#allocation7 + $0x170] ss:$8 sps:$4 sm:$0xff]   ;;  %v1635_v55 = vld [vmem:[#allocation7 + $0x184] ss:$8 sps:$4 sm:$0xff]   ;;  %v1633_v56 = vld [vmem:[#allocation7 + $0x180] ss:$8 sps:$4 sm:$0xff]  }
  0x6d   :  { %635 = vmatpush1.bf16.msra.mxu0 %v1612_v42  ;;  %v1638_v57 = vld [vmem:[#allocation7 + $0x194] ss:$8 sps:$4 sm:$0xff]   ;;  %v1636_v58 = vld [vmem:[#allocation7 + $0x190] ss:$8 sps:$4 sm:$0xff]   ;;  %v1641_v59 = vld [vmem:[#allocation7 + $0x1a4] ss:$8 sps:$4 sm:$0xff]  }
  0x6e   :  { %390 = vmatpush1.bf16.msra.mxu1 %v1575_v16  ;;  %636 = vmatprep.subr.bf16.mxu0 %v1617_v43  ;;  %v1639_v60 = vld [vmem:[#allocation7 + $0x1a0] ss:$8 sps:$4 sm:$0xff]   ;;  %v1644_v61 = vld [vmem:[#allocation7 + $0x1b4] ss:$8 sps:$4 sm:$0xff]   ;;  %v1642_v62 = vld [vmem:[#allocation7 + $0x1b0] ss:$8 sps:$4 sm:$0xff]  }
  0x6f   :  { %391 = vmatprep.subr.bf16.mxu1 %v1576_v17  ;;  %v1647_v63 = vld [vmem:[#allocation7 + $0x1c4] ss:$8 sps:$4 sm:$0xff]   ;;  %v1645_v0 = vld [vmem:[#allocation7 + $0x1c0] ss:$8 sps:$4 sm:$0xff]   ;;  %v1650_v1 = vld [vmem:[#allocation7 + $0x1d4] ss:$8 sps:$4 sm:$0xff]  }
  0x70   :  { %v1648_v2 = vld [vmem:[#allocation7 + $0x1d0] ss:$8 sps:$4 sm:$0xff]   ;;  %v98_v4 = vshrl.u32 %v97_v3, 7  ;;  %v95_v6 = vld [vmem:[#allocation8] ss:$8 sm:$0x3] }
  0x71   :  { %637 = vmatpush1.bf16.msra.mxu0 %v1615_v44  ;;  %v1678_v39 = vld [vmem:[#allocation7 + $0x270] ss:$8 sps:$4 sm:$0xff]   ;;  %v1683_v40 = vld [vmem:[#allocation7 + $0x284] ss:$8 sps:$4 sm:$0xff]   ;;  %v1681_v41 = vld [vmem:[#allocation7 + $0x280] ss:$8 sps:$4 sm:$0xff]  }
  0x72   :  { %392 = vmatpush1.bf16.msra.mxu1 %v1578_v18  ;;  %638 = vmatprep.subr.bf16.mxu0 %v1620_v45  ;;  %v2021_v5 = vsub.s32 0, %v98_v4  ;;  %v2023_v7 = vsub.s32 1, %v98_v4  ;;  %v1686_v42 = vld [vmem:[#allocation7 + $0x294] ss:$8 sps:$4 sm:$0xff]   ;;  %v1684_v43 = vld [vmem:[#allocation7 + $0x290] ss:$8 sps:$4 sm:$0xff]  }
  0x73   :  { %393 = vmatprep.subr.bf16.mxu1 %v1579_v19  ;;  %v1689_v44 = vld [vmem:[#allocation7 + $0x2a4] ss:$8 sps:$4 sm:$0xff]   ;;  %v1687_v45 = vld [vmem:[#allocation7 + $0x2a0] ss:$8 sps:$4 sm:$0xff]   ;;  %v1704_v3 = vld [vmem:[#allocation7 + $0x2f4] ss:$8 sps:$4 sm:$0xff]  }
  0x74   :  { %v100_v8 = vrot.slane %v95_v6, %v2021_v5  ;;  %v104_v9 = vrot.slane %v95_v6, %v2023_v7  ;;  %v1702_v4 = vld [vmem:[#allocation7 + $0x2f0] ss:$8 sps:$4 sm:$0xff]   ;;  %v1705_v6 = vld [vmem:[#allocation7 + $0x300] ss:$8 sps:$4 sm:$0xff]   ;;  %s1361_s11 = sshll.u32 %s1919_s10, 4  ;;  %s1362_s11 = int_to_ptr.vmem [resolvable:$true] %s1361_s11 }
  0x75   :  { %639 = vmatpush1.bf16.msra.mxu0 %v1618_v46  ;;  %v1692_v46 = vld [vmem:[#allocation7 + $0x2b4] ss:$8 sps:$4 sm:$0xff]   ;;  %s1879_s12 = scalar_lea.vmem %s1362_s11, 128  ;;  %p1884_p13 = scmp.lt.s32.totalorder %s1362_s11, %s1362_s11 }
  0x76   :  { %394 = vmatpush1.bf16.msra.mxu1 %v1581_v20  ;;  %640 = vmatprep.subr.bf16.mxu0 %v1623_v47  ;;  %v1653_v20 = vld [vmem:[#allocation7 + $0x1e4] ss:$8 sps:$4 sm:$0xff]   ;;  %v1690_v47 = vld [vmem:[#allocation7 + $0x2b0] ss:$8 sps:$4 sm:$0xff]   ;;  %p1880_p12 = scmp.ne.s32.totalorder %s1362_s11, %s1879_s12  ;;  %p1885_p0 = scmp.lt.s32.totalorder %s1879_s12, %s1879_s12 }
  0x77   :  { %395 = vmatprep.subr.bf16.mxu1 %v1582_v21  ;;  %v1651_v21 = vld [vmem:[#allocation7 + $0x1e0] ss:$8 sps:$4 sm:$0xff]  }
  0x78   :  { %p1886_p1 = por %p1885_p0, %p1884_p13 }
  0x79   :  { %641 = vmatpush1.bf16.msra.mxu0 %v1621_v48  ;;  %v1695_v48 = vld [vmem:[#allocation7 + $0x2c4] ss:$8 sps:$4 sm:$0xff]  }
  0x7a   :  { %396 = vmatpush1.bf16.msra.mxu1 %v1584_v22  ;;  %642 = vmatprep.subr.bf16.mxu0 %v1626_v49  ;;  %v1656_v22 = vld [vmem:[#allocation7 + $0x1f4] ss:$8 sps:$4 sm:$0xff]   ;;  %v1693_v49 = vld [vmem:[#allocation7 + $0x2c0] ss:$8 sps:$4 sm:$0xff]   ;;  %p1887_p2 = pnand %p1886_p1, %p1880_p12 }
  0x7b   :  { %397 = vmatprep.subr.bf16.mxu1 %v1585_v23  ;;  %v1654_v23 = vld [vmem:[#allocation7 + $0x1f0] ss:$8 sps:$4 sm:$0xff]  }
  0x7d   :  { %643 = vmatpush1.bf16.msra.mxu0 %v1624_v50  ;;  %v1698_v50 = vld [vmem:[#allocation7 + $0x2d4] ss:$8 sps:$4 sm:$0xff]  }
  0x7e   :  { %398 = vmatpush1.bf16.msra.mxu1 %v1587_v24  ;;  %644 = vmatprep.subr.bf16.mxu0 %v1629_v51  ;;  %v1657_v24 = vld [vmem:[#allocation7 + $0x200] ss:$8 sps:$4 sm:$0xff]   ;;  %v1696_v51 = vld [vmem:[#allocation7 + $0x2d0] ss:$8 sps:$4 sm:$0xff]  }
  0x7f   :  { %399 = vmatprep.subr.bf16.mxu1 %v1588_v25  ;;  %v1659_v25 = vld [vmem:[#allocation7 + $0x204] ss:$8 sps:$4 sm:$0xff]  }
  0x81   :  { %645 = vmatpush1.bf16.msra.mxu0 %v1627_v52  ;;  %v209_v52 = vld [vmem:[#allocation8 + $0x1] ss:$8 sm:$0x3] }
  0x82   :  { %400 = vmatpush1.bf16.msra.mxu1 %v1590_v26  ;;  %646 = vmatprep.subr.bf16.mxu0 %v1632_v53  ;;  %v1662_v26 = vld [vmem:[#allocation7 + $0x214] ss:$8 sps:$4 sm:$0xff]   ;;  %v214_v53 = vrot.slane %v209_v52, %v2021_v5 }
  0x83   :  { %401 = vmatprep.subr.bf16.mxu1 %v1591_v27  ;;  %v1660_v27 = vld [vmem:[#allocation7 + $0x210] ss:$8 sps:$4 sm:$0xff]  }
  0x85   :  { %647 = vmatpush1.bf16.msra.mxu0 %v1630_v54  ;;  %v218_v54 = vrot.slane %v209_v52, %v2023_v7  ;;  %v1753_v52 = vld [vmem:[#allocation10 + $0x40] sm:$0xff]  }
  0x86   :  { %402 = vmatpush1.bf16.msra.mxu1 %v1593_v28  ;;  %648 = vmatprep.subr.bf16.mxu0 %v1635_v55  ;;  %v1665_v28 = vld [vmem:[#allocation7 + $0x224] ss:$8 sps:$4 sm:$0xff]  }
  0x87   :  { %403 = vmatprep.subr.bf16.mxu1 %v1594_v29  ;;  %v1663_v29 = vld [vmem:[#allocation7 + $0x220] ss:$8 sps:$4 sm:$0xff]  }
  0x89   :  { %649 = vmatpush1.bf16.msra.mxu0 %v1633_v56 }
  0x8a   :  { %404 = vmatpush1.bf16.msra.mxu1 %v1596_v30  ;;  %650 = vmatprep.subr.bf16.mxu0 %v1638_v57  ;;  %v1668_v30 = vld [vmem:[#allocation7 + $0x234] ss:$8 sps:$4 sm:$0xff]  }
  0x8b   :  { %405 = vmatprep.subr.bf16.mxu1 %v1597_v31  ;;  %v1666_v31 = vld [vmem:[#allocation7 + $0x230] ss:$8 sps:$4 sm:$0xff]  }
  0x8d   :  { %651 = vmatpush1.bf16.msra.mxu0 %v1636_v58 }
  0x8e   :  { %406 = vmatpush1.bf16.msra.mxu1 %v1599_v32  ;;  %652 = vmatprep.subr.bf16.mxu0 %v1641_v59  ;;  %v1671_v32 = vld [vmem:[#allocation7 + $0x244] ss:$8 sps:$4 sm:$0xff]  }
  0x8f   :  { %407 = vmatprep.subr.bf16.mxu1 %v1600_v33  ;;  %v1669_v33 = vld [vmem:[#allocation7 + $0x240] ss:$8 sps:$4 sm:$0xff]  }
  0x91   :  { %653 = vmatpush1.bf16.msra.mxu0 %v1639_v60 }
  0x92   :  { %408 = vmatpush1.bf16.msra.mxu1 %v1602_v34  ;;  %654 = vmatprep.subr.bf16.mxu0 %v1644_v61  ;;  %v1674_v34 = vld [vmem:[#allocation7 + $0x254] ss:$8 sps:$4 sm:$0xff]  }
  0x93   :  { %409 = vmatprep.subr.bf16.mxu1 %v1603_v35  ;;  %v1672_v35 = vld [vmem:[#allocation7 + $0x250] ss:$8 sps:$4 sm:$0xff]  }
  0x95   :  { %655 = vmatpush1.bf16.msra.mxu0 %v1642_v62 }
  0x96   :  { %410 = vmatpush1.bf16.msra.mxu1 %v1605_v36  ;;  %656 = vmatprep.subr.bf16.mxu0 %v1647_v63  ;;  %v1677_v36 = vld [vmem:[#allocation7 + $0x264] ss:$8 sps:$4 sm:$0xff]  }
  0x97   :  { %411 = vmatprep.subr.bf16.mxu1 %v1606_v37  ;;  %v1675_v37 = vld [vmem:[#allocation7 + $0x260] ss:$8 sps:$4 sm:$0xff]  }
  0x99   :  { %657 = vmatpush1.bf16.msra.mxu0 %v1645_v0 }
  0x9a   :  { %412 = vmatpush1.bf16.msra.mxu1 %v1608_v38  ;;  %658 = vmatprep.subr.bf16.mxu0 %v1650_v1  ;;  %v1680_v38 = vld [vmem:[#allocation7 + $0x274] ss:$8 sps:$4 sm:$0xff]   ;;  %v1701_v1 = vld [vmem:[#allocation7 + $0x2e4] ss:$8 sps:$4 sm:$0xff]  }
  0x9b   :  { %883 = vmatprep.subr.bf16.mxu1 %v1659_v25  ;;  %v1734_v25 = vld [vmem:[#allocation7 + $0x394] ss:$8 sps:$4 sm:$0xff]  }
  0x9d   :  { %659 = vmatpush1.bf16.msra.mxu0 %v1648_v2  ;;  %v1699_v2 = vld [vmem:[#allocation7 + $0x2e0] ss:$8 sps:$4 sm:$0xff]  }
  0x9e   :  { %660 = vmatprep.subr.bf16.mxu0 %v1653_v20  ;;  %v1723_v20 = vld [vmem:[#allocation7 + $0x360] ss:$8 sps:$4 sm:$0xff]  }
  0xa1   :  { %661 = vmatpush1.bf16.msra.mxu0 %v1651_v21  ;;  %v1728_v21 = vld [vmem:[#allocation7 + $0x374] ss:$8 sps:$4 sm:$0xff]  }
  0xa2   :  { %662 = vmatprep.subr.bf16.mxu0 %v1656_v22  ;;  %v1726_v22 = vld [vmem:[#allocation7 + $0x370] ss:$8 sps:$4 sm:$0xff]  }
  0xa5   :  { %663 = vmatpush1.bf16.msra.mxu0 %v1654_v23  ;;  %v1731_v23 = vld [vmem:[#allocation7 + $0x384] ss:$8 sps:$4 sm:$0xff]  }
 0x136   :  { %v165_v10 = vpop.f32.mrb[0].mxu0 }
 0x137   :  { %v166_v11 = vadd.f32 %v165_v10, %v100_v8  ;;  %v167_v12 = vpop.f32.mrb[1].mxu0  ;;  %v1707_v8 = vld [vmem:[#allocation7 + $0x304] ss:$8 sps:$4 sm:$0xff]   ;;  %v1708_v10 = vld [vmem:[#allocation7 + $0x310] ss:$8 sps:$4 sm:$0xff]  }
 0x138   :  { %v168_v13 = vadd.f32 %v167_v12, %v104_v9  ;;  %v169_v14 = vpop.f32.mrb[2].mxu0  ;;  %v1710_v9 = vld [vmem:[#allocation7 + $0x314] ss:$8 sps:$4 sm:$0xff]   ;;  %1134 = vmatprep.subr.bf16.mxu0 %v1707_v8  ;;  %v1711_v12 = vld [vmem:[#allocation7 + $0x320] ss:$8 sps:$4 sm:$0xff]  }
 0x139   :  { %v172_v15 = vmax.f32 %v166_v11, 0.0  ;;  %v170_v16 = vpop.f32.mrb[3].mxu0  ;;  %v1713_v11 = vld [vmem:[#allocation7 + $0x324] ss:$8 sps:$4 sm:$0xff]   ;;  %v1714_v14 = vld [vmem:[#allocation7 + $0x330] ss:$8 sps:$4 sm:$0xff]  }
 0x13a   :  { %v173_v17 = vmax.f32 %v168_v13, 0.0  ;;  %v1716_v13 = vld [vmem:[#allocation7 + $0x334] ss:$8 sps:$4 sm:$0xff]   ;;  %v1717_v16 = vld [vmem:[#allocation7 + $0x340] ss:$8 sps:$4 sm:$0xff]  }
 0x13b   :  { %v174_v19 = vpack.c.bf16 %v172_v15, %v172_v15  ;;  %v1719_v15 = vld [vmem:[#allocation7 + $0x344] ss:$8 sps:$4 sm:$0xff]  }
 0x13c   :  { %v175_v18 = vpack.c.bf16 %v173_v17, %v173_v17  ;;  %v1722_v17 = vld [vmem:[#allocation7 + $0x354] ss:$8 sps:$4 sm:$0xff]  }
 0x13e   :  { %413 = vmatprep.mubr.bf16.mxu1 %v175_v18  ;;  %v1720_v18 = vld [vmem:[#allocation7 + $0x350] ss:$8 sps:$4 sm:$0xff]  }
 0x13f   :  { %414 = vmatmul.mubr.bf16.vlgmr.msra.gmra.mrb[0].mxu1 %v174_v19  ;;  %v1725_v19 = vld [vmem:[#allocation7 + $0x364] ss:$8 sps:$4 sm:$0xff]  }
 0x140   :  { %884 = vmatpush1.bf16.msra.mxu1 %v1657_v24  ;;  %v1729_v24 = vld [vmem:[#allocation7 + $0x380] ss:$8 sps:$4 sm:$0xff]  }
 0x141   :  { %885 = vmatprep.subr.bf16.mxu1 %v1662_v26  ;;  %v1732_v26 = vld [vmem:[#allocation7 + $0x390] ss:$8 sps:$4 sm:$0xff]  }
 0x144   :  { %886 = vmatpush1.bf16.msra.mxu1 %v1660_v27  ;;  %v1737_v27 = vld [vmem:[#allocation7 + $0x3a4] ss:$8 sps:$4 sm:$0xff]  }
 0x145   :  { %887 = vmatprep.subr.bf16.mxu1 %v1665_v28  ;;  %v1735_v28 = vld [vmem:[#allocation7 + $0x3a0] ss:$8 sps:$4 sm:$0xff]  }
 0x148   :  { %888 = vmatpush1.bf16.msra.mxu1 %v1663_v29  ;;  %v1740_v29 = vld [vmem:[#allocation7 + $0x3b4] ss:$8 sps:$4 sm:$0xff]  }
 0x149   :  { %889 = vmatprep.subr.bf16.mxu1 %v1668_v30  ;;  %v1738_v30 = vld [vmem:[#allocation7 + $0x3b0] ss:$8 sps:$4 sm:$0xff]  }
 0x14c   :  { %890 = vmatpush1.bf16.msra.mxu1 %v1666_v31  ;;  %v1743_v31 = vld [vmem:[#allocation7 + $0x3c4] ss:$8 sps:$4 sm:$0xff]  }
 0x14d   :  { %891 = vmatprep.subr.bf16.mxu1 %v1671_v32  ;;  %v1741_v32 = vld [vmem:[#allocation7 + $0x3c0] ss:$8 sps:$4 sm:$0xff]  }
 0x150   :  { %892 = vmatpush1.bf16.msra.mxu1 %v1669_v33  ;;  %v1746_v33 = vld [vmem:[#allocation7 + $0x3d4] ss:$8 sps:$4 sm:$0xff]  }
 0x151   :  { %893 = vmatprep.subr.bf16.mxu1 %v1674_v34  ;;  %v1744_v34 = vld [vmem:[#allocation7 + $0x3d0] ss:$8 sps:$4 sm:$0xff]  }
 0x154   :  { %894 = vmatpush1.bf16.msra.mxu1 %v1672_v35  ;;  %v460_v35 = vld [vmem:[#allocation8 + $0x2] ss:$8 sm:$0x3] }
 0x155   :  { %895 = vmatprep.subr.bf16.mxu1 %v1677_v36  ;;  %v465_v36 = vrot.slane %v460_v35, %v2021_v5 }
 0x158   :  { %896 = vmatpush1.bf16.msra.mxu1 %v1675_v37  ;;  %v469_v37 = vrot.slane %v460_v35, %v2023_v7 }
 0x159   :  { %897 = vmatprep.subr.bf16.mxu1 %v1680_v38 }
 0x15c   :  { %898 = vmatpush1.bf16.msra.mxu1 %v1678_v39 }
 0x15d   :  { %899 = vmatprep.subr.bf16.mxu1 %v1683_v40 }
 0x160   :  { %900 = vmatpush1.bf16.msra.mxu1 %v1681_v41 }
 0x161   :  { %901 = vmatprep.subr.bf16.mxu1 %v1686_v42 }
 0x164   :  { %902 = vmatpush1.bf16.msra.mxu1 %v1684_v43 }
 0x165   :  { %903 = vmatprep.subr.bf16.mxu1 %v1689_v44 }
 0x168   :  { %904 = vmatpush1.bf16.msra.mxu1 %v1687_v45 }
 0x169   :  { %905 = vmatprep.subr.bf16.mxu1 %v1692_v46 }
 0x16c   :  { %906 = vmatpush1.bf16.msra.mxu1 %v1690_v47 }
 0x16d   :  { %907 = vmatprep.subr.bf16.mxu1 %v1695_v48  ;;  %v1749_v48 = vld [vmem:[#allocation7 + $0x3e4] ss:$8 sps:$4 sm:$0xff]  }
 0x170   :  { %908 = vmatpush1.bf16.msra.mxu1 %v1693_v49  ;;  %v1747_v49 = vld [vmem:[#allocation7 + $0x3e0] ss:$8 sps:$4 sm:$0xff]  }
 0x171   :  { %909 = vmatprep.subr.bf16.mxu1 %v1698_v50  ;;  %v1752_v50 = vld [vmem:[#allocation7 + $0x3f4] ss:$8 sps:$4 sm:$0xff]  }
 0x174   :  { %910 = vmatpush1.bf16.msra.mxu1 %v1696_v51  ;;  %v1750_v51 = vld [vmem:[#allocation7 + $0x3f0] ss:$8 sps:$4 sm:$0xff]  }
 0x175   :  { %911 = vmatprep.subr.bf16.mxu1 %v1701_v1 }
 0x178   :  { %912 = vmatpush1.bf16.msra.mxu1 %v1699_v2 }
 0x179   :  { %913 = vmatprep.subr.bf16.mxu1 %v1704_v3 }
 0x17c   :  { %914 = vmatpush1.bf16.msra.mxu1 %v1702_v4 }
 0x17d   :  { %1522 = vmatprep.subr.bf16.mxu1 %v1753_v52 }
 0x212   :  { %v415_v55 = vpop.f32.mrb[0].mxu1 }
 0x213   :  { %v416_v56 = vadd.f32 %v415_v55, %v214_v53  ;;  %v417_v57 = vpop.f32.mrb[1].mxu1  ;;  %v1754_v53 = vld [vmem:[#allocation10] sm:$0xff]   ;;  %v1756_v55 = vld [vmem:[#allocation10 + $0x8] sm:$0xff]  }
 0x214   :  { %v418_v58 = vadd.f32 %v417_v57, %v218_v54  ;;  %v419_v59 = vpop.f32.mrb[2].mxu1  ;;  %v1755_v54 = vld [vmem:[#allocation10 + $0x48] sm:$0xff]   ;;  %v1758_v57 = vld [vmem:[#allocation10 + $0x10] sm:$0xff]  }
 0x215   :  { %v422_v60 = vmax.f32 %v416_v56, 0.0  ;;  %v420_v61 = vpop.f32.mrb[3].mxu1  ;;  %v1757_v56 = vld [vmem:[#allocation10 + $0x50] sm:$0xff]   ;;  %v1760_v59 = vld [vmem:[#allocation10 + $0x18] sm:$0xff]  }
 0x216   :  { %v423_v62 = vmax.f32 %v418_v58, 0.0  ;;  %v1759_v58 = vld [vmem:[#allocation10 + $0x58] sm:$0xff]   ;;  %v1762_v61 = vld [vmem:[#allocation10 + $0x20] sm:$0xff]  }
 0x217   :  { %v424_v0 = vpack.c.bf16 %v422_v60, %v422_v60  ;;  %v1761_v60 = vld [vmem:[#allocation10 + $0x60] sm:$0xff]  }
 0x218   :  { %v425_v63 = vpack.c.bf16 %v423_v62, %v423_v62  ;;  %v1763_v62 = vld [vmem:[#allocation10 + $0x68] sm:$0xff]  }
 0x21a   :  { %664 = vmatprep.mubr.bf16.mxu0 %v425_v63  ;;  %v1764_v63 = vld [vmem:[#allocation10 + $0x28] sm:$0xff]  }
 0x21b   :  { %665 = vmatmul.mubr.bf16.vlgmr.msra.gmra.mrb[4].mxu0 %v424_v0  ;;  %v711_v0 = vld [vmem:[#allocation8 + $0x3] ss:$8 sm:$0x3] }
 0x21c   :  { %1135 = vmatpush1.bf16.msra.mxu0 %v1705_v6  ;;  %v716_v1 = vrot.slane %v711_v0, %v2021_v5  ;;  %v720_v2 = vrot.slane %v711_v0, %v2023_v7 }
 0x21d   :  { %1136 = vmatprep.subr.bf16.mxu0 %v1710_v9 }
 0x220   :  { %1137 = vmatpush1.bf16.msra.mxu0 %v1708_v10 }
 0x221   :  { %1138 = vmatprep.subr.bf16.mxu0 %v1713_v11 }
 0x224   :  { %1139 = vmatpush1.bf16.msra.mxu0 %v1711_v12 }
 0x225   :  { %1140 = vmatprep.subr.bf16.mxu0 %v1716_v13 }
 0x228   :  { %1141 = vmatpush1.bf16.msra.mxu0 %v1714_v14 }
 0x229   :  { %1142 = vmatprep.subr.bf16.mxu0 %v1719_v15  ;;  %v1765_v15 = vld [vmem:[#allocation10 + $0x70] sm:$0xff]  }
 0x22c   :  { %1143 = vmatpush1.bf16.msra.mxu0 %v1717_v16  ;;  %v1766_v16 = vld [vmem:[#allocation10 + $0x30] sm:$0xff]  }
 0x22d   :  { %1144 = vmatprep.subr.bf16.mxu0 %v1722_v17  ;;  %v1767_v17 = vld [vmem:[#allocation10 + $0x78] sm:$0xff]  }
 0x230   :  { %1145 = vmatpush1.bf16.msra.mxu0 %v1720_v18  ;;  %v1768_v18 = vld [vmem:[#allocation10 + $0x38] sm:$0xff]  }
 0x231   :  { %1146 = vmatprep.subr.bf16.mxu0 %v1725_v19  ;;  %v962_v19 = vld [vmem:[#allocation8 + $0x4] ss:$8 sm:$0x3] }
 0x234   :  { %1147 = vmatpush1.bf16.msra.mxu0 %v1723_v20  ;;  %v967_v20 = vrot.slane %v962_v19, %v2021_v5 }
 0x235   :  { %1148 = vmatprep.subr.bf16.mxu0 %v1728_v21  ;;  %v971_v21 = vrot.slane %v962_v19, %v2023_v7 }
 0x238   :  { %1149 = vmatpush1.bf16.msra.mxu0 %v1726_v22 }
 0x239   :  { %1150 = vmatprep.subr.bf16.mxu0 %v1731_v23 }
 0x23c   :  { %1151 = vmatpush1.bf16.msra.mxu0 %v1729_v24 }
 0x23d   :  { %1152 = vmatprep.subr.bf16.mxu0 %v1734_v25 }
 0x240   :  { %1153 = vmatpush1.bf16.msra.mxu0 %v1732_v26 }
 0x241   :  { %1154 = vmatprep.subr.bf16.mxu0 %v1737_v27 }
 0x244   :  { %1155 = vmatpush1.bf16.msra.mxu0 %v1735_v28 }
 0x245   :  { %1156 = vmatprep.subr.bf16.mxu0 %v1740_v29 }
 0x248   :  { %1157 = vmatpush1.bf16.msra.mxu0 %v1738_v30 }
 0x249   :  { %1158 = vmatprep.subr.bf16.mxu0 %v1743_v31 }
 0x24c   :  { %1159 = vmatpush1.bf16.msra.mxu0 %v1741_v32 }
 0x24d   :  { %1160 = vmatprep.subr.bf16.mxu0 %v1746_v33  ;;  %v1505_v33 = vld [vmem:[%s2055_s5] ss:$0 sm:$0xff] }
 0x250   :  { %1161 = vmatpush1.bf16.msra.mxu0 %v1744_v34 }
 0x251   :  { %1162 = vmatprep.subr.bf16.mxu0 %v1749_v48 }
 0x254   :  { %1163 = vmatpush1.bf16.msra.mxu0 %v1747_v49 }
 0x255   :  { %1164 = vmatprep.subr.bf16.mxu0 %v1752_v50 }
 0x258   :  { %1165 = vmatpush1.bf16.msra.mxu0 %v1750_v51 }
 0x2ee   :  { %v666_v38 = vpop.f32.mrb[4].mxu0 }
 0x2ef   :  { %v667_v39 = vadd.f32 %v666_v38, %v465_v36  ;;  %v668_v40 = vpop.f32.mrb[5].mxu0 }
 0x2f0   :  { %v669_v41 = vadd.f32 %v668_v40, %v469_v37  ;;  %v670_v42 = vpop.f32.mrb[6].mxu0 }
 0x2f1   :  { %v673_v43 = vmax.f32 %v667_v39, 0.0  ;;  %v671_v44 = vpop.f32.mrb[7].mxu0 }
 0x2f2   :  { %v674_v45 = vmax.f32 %v669_v41, 0.0 }
 0x2f3   :  { %v675_v47 = vpack.c.bf16 %v673_v43, %v673_v43 }
 0x2f4   :  { %v676_v46 = vpack.c.bf16 %v674_v45, %v674_v45 }
 0x2f6   :  { %915 = vmatprep.mubr.bf16.mxu1 %v676_v46 }
 0x2f7   :  { %916 = vmatmul.mubr.bf16.vlgmr.msra.gmra.mrb[4].mxu1 %v675_v47 }
 0x2f8   :  { %1523 = vmatpush3.bf16.msra.mxu1 %v1754_v53 }
 0x2f9   :  { %1524 = vmatprep.subr.bf16.mxu1 %v1755_v54 }
 0x2fc   :  { %1525 = vmatpush3.bf16.msra.mxu1 %v1756_v55 }
 0x2fd   :  { %1526 = vmatprep.subr.bf16.mxu1 %v1757_v56 }
 0x300   :  { %1527 = vmatpush3.bf16.msra.mxu1 %v1758_v57 }
 0x301   :  { %1528 = vmatprep.subr.bf16.mxu1 %v1759_v58 }
 0x304   :  { %1529 = vmatpush3.bf16.msra.mxu1 %v1760_v59 }
 0x305   :  { %1530 = vmatprep.subr.bf16.mxu1 %v1761_v60 }
 0x308   :  { %1531 = vmatpush3.bf16.msra.mxu1 %v1762_v61 }
 0x309   :  { %1532 = vmatprep.subr.bf16.mxu1 %v1763_v62 }
 0x30c   :  { %1533 = vmatpush3.bf16.msra.mxu1 %v1764_v63 }
 0x30d   :  { %1534 = vmatprep.subr.bf16.mxu1 %v1765_v15 }
 0x310   :  { %1535 = vmatpush3.bf16.msra.mxu1 %v1766_v16 }
 0x311   :  { %1536 = vmatprep.subr.bf16.mxu1 %v1767_v17 }
 0x314   :  { %1537 = vmatpush3.bf16.msra.mxu1 %v1768_v18 }
 0x3ca   :  { %v917_v3 = vpop.f32.mrb[4].mxu1 }
 0x3cb   :  { %v918_v4 = vadd.f32 %v917_v3, %v716_v1  ;;  %v919_v6 = vpop.f32.mrb[5].mxu1 }
 0x3cc   :  { %v920_v8 = vadd.f32 %v919_v6, %v720_v2  ;;  %v921_v9 = vpop.f32.mrb[6].mxu1 }
 0x3cd   :  { %v924_v10 = vmax.f32 %v918_v4, 0.0  ;;  %v922_v11 = vpop.f32.mrb[7].mxu1 }
 0x3ce   :  { %v925_v12 = vmax.f32 %v920_v8, 0.0 }
 0x3cf   :  { %v926_v14 = vpack.c.bf16 %v924_v10, %v924_v10 }
 0x3d0   :  { %v927_v13 = vpack.c.bf16 %v925_v12, %v925_v12 }
 0x3d2   :  { %1166 = vmatprep.mubr.bf16.mxu0 %v927_v13 }
 0x3d3   :  { %1167 = vmatmul.mubr.bf16.vlgmr.msra.gmra.mrb[8].mxu0 %v926_v14 }
 0x4a6   :  { %v1168_v22 = vpop.f32.mrb[8].mxu0 }
 0x4a7   :  { %v1169_v23 = vadd.f32 %v1168_v22, %v967_v20  ;;  %v1170_v24 = vpop.f32.mrb[9].mxu0 }
 0x4a8   :  { %v1171_v25 = vadd.f32 %v1170_v24, %v971_v21  ;;  %v1172_v26 = vpop.f32.mrb[10].mxu0 }
 0x4a9   :  { %v1175_v27 = vmax.f32 %v1169_v23, 0.0  ;;  %v1173_v28 = vpop.f32.mrb[11].mxu0 }
 0x4aa   :  { %v1176_v29 = vmax.f32 %v1171_v25, 0.0 }
 0x4ab   :  { %v1177_v31 = vpack.c.bf16 %v1175_v27, %v1175_v27 }
 0x4ac   :  { %v1178_v30 = vpack.c.bf16 %v1176_v29, %v1176_v29 }
 0x4ae   :  { %1346 = vmatprep.mubr.bf16.mxu1 %v1178_v30 }
 0x4af   :  { %1347 = vmatmul.mubr.bf16.vlgmr.msra.gmra.mrb[8].mxu1 %v1177_v31 }
 0x582   :  { %v1538_v32 = vpop.f32.mrb[8].mxu1 }
 0x583   :  { %v1539_v5 = vpop.f32.mrb[9].mxu1 }
 0x584   :  { %v1540_v7 = vadd.f32 %v1539_v5, %v1538_v32  ;;  %v1541_v34 = vpop.f32.mrb[10].mxu1 }
 0x585   :  { %v1542_v35 = vpop.f32.mrb[11].mxu1 }
 0x586   :  { %v1349_v36 = vadd.f32 %v1540_v7, %v1505_v33 }
 0x588   :  { %1354 = vst [vmem:[#allocation11] sm:$0xff] %v1349_v36 }
 0x589   :  { %1890 = shalt.err (!%p1887_p2)
}
 0x58a   :  { %s1891_s5 = scalar_lea.hbm %s2056_s6, 128 }
 0x58b   :  { %p1892_p3 = scmp.ne.s32.totalorder %s2056_s6, %s1891_s5  ;;  %p1895_p4 = scmp.lt.u32.totalorder %s1891_s5, %s2056_s6 }
 0x58d   :  { %p1897_p5 = pnand %p1895_p4, %p1892_p3 }
 0x58f   :  { %1900 = shalt.err (!%p1897_p5)
}
 0x590   :  { %1364 = dma.vmem_to_hbm [thread:$0]  %s1362_s11, 128, %s2056_s6, [#allocation4]  }
 0x591   :  { %1907 = dma.done.wait [#allocation4], 128  }
 0x592   :  { %1908 = vsyncadd [#allocation4], 4294967168 }
 0x593   :  { %1368 = vsyncpa [#allocation3], 1 }
 0x594   :  { %1369 = vsyncpa [#allocation6], 1 }
 0x595   :  { %1370 = vsyncpa [#allocation9], 1 }
 0x596   :  { %1371 = vsyncpa [#allocation4], 1 }

</bundles_post_ra>
